<compile_context>
chip_gen: v6e
topology: v6e:2x2x1
jax: 0.10.0
libtpu: 0.0.40
codegen_flags: <defaults>
</compile_context>

<pallas_src>
import jax
import jax.numpy as jnp
from jax.experimental import pallas as pl
from jax.experimental.pallas import tpu as pltpu

FEAT_IN = 225
MAX_TILE_B = 2048
VMEM_LIMIT_BYTES = 40 * 1024 * 1024


def mlp_kernel(x_ref, w1_ref, b1_ref, w2_ref, b2_ref,
               w3_ref, b3_ref, w4_ref, b4_ref, out_ref):
    # Layer 1: in-kernel bf16 cast of the x tile; Mosaic masks the K=225 remainder.
    h = jnp.dot(x_ref[...].astype(jnp.bfloat16), w1_ref[...],
                preferred_element_type=jnp.float32)               # (tb, 512) f32
    h = jnp.maximum(h.astype(jnp.bfloat16) + b1_ref[...], 0)      # bf16 epilogue
    # Layer 2: (tb, 512) @ (512, 256)
    h = jnp.dot(h, w2_ref[...], preferred_element_type=jnp.float32)
    h = jnp.maximum(h.astype(jnp.bfloat16) + b2_ref[...], 0)
    # Layer 3: (tb, 256) @ (256, 128)
    h = jnp.dot(h, w3_ref[...], preferred_element_type=jnp.float32)
    h = jnp.maximum(h.astype(jnp.bfloat16) + b3_ref[...], 0)      # (tb, 128) bf16
    # Layer 4: (1,128) contracted against (tb,128) on the MXU -> lane-dense (1, tb).
    o = jax.lax.dot_general(w4_ref[...], h,
                            dimension_numbers=(((1,), (1,)), ((), ())),
                            preferred_element_type=jnp.float32)   # (1, tb) f32
    out_ref[...] = (o + b4_ref[...]).astype(out_ref.dtype)


def _round_up(v, m):
    return ((v + m - 1) // m) * m


def _choose_tile(batch, max_tile_b):
    """Balanced batch tiles; >= 2 tiles for non-trivial batches (v7x megacore)."""
    min_tiles = 2 if batch >= 256 else 1
    num_tiles = max(min_tiles, -(-batch // max_tile_b))
    if num_tiles == 1:
        tb = _round_up(batch, 8)          # single tile: sublane-aligned is enough
    else:
        tb = _round_up(-(-batch // num_tiles), 128)   # lane-dense output rows
        num_tiles = -(-batch // tb)
    return tb, num_tiles, num_tiles * tb


def prepare_params(params):
    """One-time parameter prep (bf16 casts / reshapes), hoisted out of forward."""
    (w1, b1), (w2, b2), (w3, b3), (w4, b4) = params
    return {
        "w1": jnp.asarray(w1, jnp.bfloat16),                      # (225, 512)
        "b1": jnp.asarray(b1, jnp.bfloat16).reshape(1, 512),
        "w2": jnp.asarray(w2, jnp.bfloat16),                      # (512, 256)
        "b2": jnp.asarray(b2, jnp.bfloat16).reshape(1, 256),
        "w3": jnp.asarray(w3, jnp.bfloat16),                      # (256, 128)
        "b3": jnp.asarray(b3, jnp.bfloat16).reshape(1, 128),
        "w4": jnp.asarray(w4, jnp.float32).reshape(1, 128).astype(jnp.bfloat16),
        "b4": jnp.asarray(b4, jnp.float32).reshape(1, 1),
    }


def classical_nn_forward(x, prepped, max_tile_b=MAX_TILE_B):
    batch, feat = x.shape
    assert feat == FEAT_IN

    tb, num_tiles, padded_batch = _choose_tile(batch, max_tile_b)

    x_in = x.astype(jnp.float32)
    if padded_batch != batch:
        x_in = jnp.pad(x_in, ((0, padded_batch - batch), (0, 0)))

    def const2d(shape):
        return pl.BlockSpec(shape, lambda i: (0, 0))

    flops = 2 * padded_batch * (FEAT_IN * 512 + 512 * 256 + 256 * 128 + 128)
    bytes_accessed = (
        padded_batch * FEAT_IN * 4                      # x (f32, read once)
        + (225 * 512 + 512 * 256 + 256 * 128 + 128) * 2  # bf16 weights
        + (512 + 256 + 128) * 2 + 4                      # biases
        + padded_batch * 4                               # output
    )

    out = pl.pallas_call(
        mlp_kernel,
        out_shape=jax.ShapeDtypeStruct((1, padded_batch), jnp.float32),
        grid=(num_tiles,),
        in_specs=[
            pl.BlockSpec((tb, FEAT_IN), lambda i: (i, 0)),   # x tile (pipelined)
            const2d((FEAT_IN, 512)), const2d((1, 512)),      # w1, b1 (VMEM-resident)
            const2d((512, 256)),     const2d((1, 256)),      # w2, b2
            const2d((256, 128)),     const2d((1, 128)),      # w3, b3
            const2d((1, 128)),       const2d((1, 1)),        # w4 row, b4
        ],
        out_specs=pl.BlockSpec((1, tb), lambda i: (0, i)),   # lane-dense output row
        compiler_params=pltpu.CompilerParams(
            dimension_semantics=("parallel",),
            vmem_limit_bytes=VMEM_LIMIT_BYTES),
        cost_estimate=pl.CostEstimate(
            flops=flops, bytes_accessed=bytes_accessed, transcendentals=0),
    )(x_in, prepped["w1"], prepped["b1"], prepped["w2"], prepped["b2"],
      prepped["w3"], prepped["b3"], prepped["w4"], prepped["b4"])

    return out[0, :batch].reshape(batch, 1)


def init_params(key):
    """Deterministic init mimicking nn.Linear default (uniform +/- 1/sqrt(fan_in)).

    Weights stored as (in_features, out_features) so each layer is x @ W + b
    (equivalent to torch's x @ W_torch.T + b with W = W_torch.T)."""
    dims = [(225, 512), (512, 256), (256, 128), (128, 1)]
    params = []
    for (fan_in, fan_out) in dims:
        key, kw, kb = jax.random.split(key, 3)
        bound = 1.0 / (fan_in ** 0.5)
        w = jax.random.uniform(kw, (fan_in, fan_out), jnp.float32, -bound, bound)
        b = jax.random.uniform(kb, (1, fan_out), jnp.float32, -bound, bound)
        params.append((w, b))
    return params


def reference_forward(x, params):
    (w1, b1), (w2, b2), (w3, b3), (w4, b4) = params
    h = jnp.maximum(x @ w1 + b1, 0.0)
    h = jnp.maximum(h @ w2 + b2, 0.0)
    h = jnp.maximum(h @ w3 + b3, 0.0)
    return h @ w4 + b4


if __name__ == "__main__":
    key = jax.random.PRNGKey(0)
    key, kx = jax.random.split(key)
    batch = 8
    x = jax.random.normal(kx, (batch, FEAT_IN), jnp.float32)

    params = init_params(key)
    prepped = prepare_params(params)       # one-time weight prep (hoisted)

    out = jax.block_until_ready(classical_nn_forward(x, prepped))
    ref = reference_forward(x, params)
    assert out.shape == (batch, 1)
    # bf16 matmul operands (f32 accumulation) -> loosened tolerance vs f32 ref.
    assert jnp.allclose(out, ref, atol=3e-2, rtol=3e-2), "mismatch vs reference"

    # Exercise the multi-tile (>=2 grid steps, padded batch) path as well.
    key, kx2 = jax.random.split(key)
    batch2 = 300
    x2 = jax.random.normal(kx2, (batch2, FEAT_IN), jnp.float32)
    out2 = jax.block_until_ready(classical_nn_forward(x2, prepped))
    ref2 = reference_forward(x2, params)
    assert out2.shape == (batch2, 1)
    assert jnp.allclose(out2, ref2, atol=3e-2, rtol=3e-2), "mismatch (multi-tile)"

    print("KERNEL_OK")
</pallas_src>

<mosaic_0001>
module attributes {stable_mosaic.version = 11 : i64} {
  func.func @mlp_kernel(%arg0: i32, %arg1: memref<8x225xf32, #tpu.memory_space<vmem>>, %arg2: memref<225x512xbf16, #tpu.memory_space<vmem>>, %arg3: memref<1x512xbf16, #tpu.memory_space<vmem>>, %arg4: memref<512x256xbf16, #tpu.memory_space<vmem>>, %arg5: memref<1x256xbf16, #tpu.memory_space<vmem>>, %arg6: memref<256x128xbf16, #tpu.memory_space<vmem>>, %arg7: memref<1x128xbf16, #tpu.memory_space<vmem>>, %arg8: memref<1x128xbf16, #tpu.memory_space<vmem>>, %arg9: memref<1x1xf32, #tpu.memory_space<vmem>>, %arg10: memref<1x8xf32, #tpu.memory_space<vmem>>) attributes {dimension_semantics = [#tpu.dimension_semantics<parallel>], iteration_bounds = array<i64: 1>, scalar_prefetch = 0 : i64, scratch_operands = 0 : i64, tpu.core_type = #tpu.core_type<tc>, window_params = [{transform_indices = @transform_0, window_bounds = array<i64: 8, 225>}, {pipeline_mode = #tpu.pipeline_mode<synchronous>, transform_indices = @transform_1, window_bounds = array<i64: 225, 512>}, {pipeline_mode = #tpu.pipeline_mode<synchronous>, transform_indices = @transform_2, window_bounds = array<i64: 1, 512>}, {pipeline_mode = #tpu.pipeline_mode<synchronous>, transform_indices = @transform_3, window_bounds = array<i64: 512, 256>}, {pipeline_mode = #tpu.pipeline_mode<synchronous>, transform_indices = @transform_4, window_bounds = array<i64: 1, 256>}, {pipeline_mode = #tpu.pipeline_mode<synchronous>, transform_indices = @transform_5, window_bounds = array<i64: 256, 128>}, {pipeline_mode = #tpu.pipeline_mode<synchronous>, transform_indices = @transform_6, window_bounds = array<i64: 1, 128>}, {pipeline_mode = #tpu.pipeline_mode<synchronous>, transform_indices = @transform_7, window_bounds = array<i64: 1, 128>}, {pipeline_mode = #tpu.pipeline_mode<synchronous>, transform_indices = @transform_8, window_bounds = array<i64: 1, 1>}, {transform_indices = @transform_9, window_bounds = array<i64: 1, 8>}]} {
    %c0 = arith.constant 0 : index
    %c0_0 = arith.constant 0 : index
    %0 = vector.load %arg1[%c0, %c0_0] : memref<8x225xf32, #tpu.memory_space<vmem>>, vector<8x225xf32>
    %1 = arith.truncf %0 : vector<8x225xf32> to vector<8x225xbf16>
    %c0_1 = arith.constant 0 : index
    %c0_2 = arith.constant 0 : index
    %2 = vector.load %arg2[%c0_1, %c0_2] : memref<225x512xbf16, #tpu.memory_space<vmem>>, vector<225x512xbf16>
    %cst = arith.constant dense<0.000000e+00> : vector<8x512xf32>
    %3 = tpu.matmul %1, %2, %cst {dimension_numbers = #tpu.dot_dimension_numbers<[1], [0], [0], [1], [0, 0, 1, 1], [], []>} : vector<8x225xbf16>, vector<225x512xbf16>, vector<8x512xf32> -> vector<8x512xf32>
    %4 = arith.truncf %3 : vector<8x512xf32> to vector<8x512xbf16>
    %c0_3 = arith.constant 0 : index
    %c0_4 = arith.constant 0 : index
    %5 = vector.load %arg3[%c0_3, %c0_4] : memref<1x512xbf16, #tpu.memory_space<vmem>>, vector<1x512xbf16>
    %6 = vector.broadcast %5 : vector<1x512xbf16> to vector<8x512xbf16>
    %7 = arith.addf %4, %6 : vector<8x512xbf16>
    %cst_5 = arith.constant 0.000000e+00 : bf16
    %8 = vector.broadcast %cst_5 : bf16 to vector<8x512xbf16>
    %9 = arith.maximumf %7, %8 : vector<8x512xbf16>
    %c0_6 = arith.constant 0 : index
    %c0_7 = arith.constant 0 : index
    %10 = vector.load %arg4[%c0_6, %c0_7] : memref<512x256xbf16, #tpu.memory_space<vmem>>, vector<512x256xbf16>
    %cst_8 = arith.constant dense<0.000000e+00> : vector<8x256xf32>
    %11 = tpu.matmul %9, %10, %cst_8 {dimension_numbers = #tpu.dot_dimension_numbers<[1], [0], [0], [1], [0, 0, 1, 1], [], []>} : vector<8x512xbf16>, vector<512x256xbf16>, vector<8x256xf32> -> vector<8x256xf32>
    %12 = arith.truncf %11 : vector<8x256xf32> to vector<8x256xbf16>
    %c0_9 = arith.constant 0 : index
    %c0_10 = arith.constant 0 : index
    %13 = vector.load %arg5[%c0_9, %c0_10] : memref<1x256xbf16, #tpu.memory_space<vmem>>, vector<1x256xbf16>
    %14 = vector.broadcast %13 : vector<1x256xbf16> to vector<8x256xbf16>
    %15 = arith.addf %12, %14 : vector<8x256xbf16>
    %cst_11 = arith.constant 0.000000e+00 : bf16
    %16 = vector.broadcast %cst_11 : bf16 to vector<8x256xbf16>
    %17 = arith.maximumf %15, %16 : vector<8x256xbf16>
    %c0_12 = arith.constant 0 : index
    %c0_13 = arith.constant 0 : index
    %18 = vector.load %arg6[%c0_12, %c0_13] : memref<256x128xbf16, #tpu.memory_space<vmem>>, vector<256x128xbf16>
    %cst_14 = arith.constant dense<0.000000e+00> : vector<8x128xf32>
    %19 = tpu.matmul %17, %18, %cst_14 {dimension_numbers = #tpu.dot_dimension_numbers<[1], [0], [0], [1], [0, 0, 1, 1], [], []>} : vector<8x256xbf16>, vector<256x128xbf16>, vector<8x128xf32> -> vector<8x128xf32>
    %20 = arith.truncf %19 : vector<8x128xf32> to vector<8x128xbf16>
    %c0_15 = arith.constant 0 : index
    %c0_16 = arith.constant 0 : index
    %21 = vector.load %arg7[%c0_15, %c0_16] : memref<1x128xbf16, #tpu.memory_space<vmem>>, vector<1x128xbf16>
    %22 = vector.broadcast %21 : vector<1x128xbf16> to vector<8x128xbf16>
    %23 = arith.addf %20, %22 : vector<8x128xbf16>
    %cst_17 = arith.constant 0.000000e+00 : bf16
    %24 = vector.broadcast %cst_17 : bf16 to vector<8x128xbf16>
    %25 = arith.maximumf %23, %24 : vector<8x128xbf16>
    %c0_18 = arith.constant 0 : index
    %c0_19 = arith.constant 0 : index
    %26 = vector.load %arg8[%c0_18, %c0_19] : memref<1x128xbf16, #tpu.memory_space<vmem>>, vector<1x128xbf16>
    %cst_20 = arith.constant dense<0.000000e+00> : vector<1x8xf32>
    %27 = tpu.matmul %26, %25, %cst_20 {dimension_numbers = #tpu.dot_dimension_numbers<[1], [1], [0], [0], [0, 0, 1, 0], [], []>} : vector<1x128xbf16>, vector<8x128xbf16>, vector<1x8xf32> -> vector<1x8xf32>
    %c0_21 = arith.constant 0 : index
    %c0_22 = arith.constant 0 : index
    %28 = vector.load %arg9[%c0_21, %c0_22] : memref<1x1xf32, #tpu.memory_space<vmem>>, vector<1x1xf32>
    %29 = vector.broadcast %28 : vector<1x1xf32> to vector<1x8xf32>
    %30 = arith.addf %27, %29 : vector<1x8xf32>
    %c0_23 = arith.constant 0 : index
    %c0_24 = arith.constant 0 : index
    %31 = vector.load %arg10[%c0_23, %c0_24] : memref<1x8xf32, #tpu.memory_space<vmem>>, vector<1x8xf32>
    tpu.vector_store %arg10[%c0_23, %c0_24], %30 {strides = array<i32>} : memref<1x8xf32, #tpu.memory_space<vmem>>, vector<1x8xf32>,
    return
  }
  func.func @transform_0(%arg0: i32) -> (i32, i32) {
    %c0_i32 = arith.constant 0 : i32
    %c0_i32_0 = arith.constant 0 : i32
    return %arg0, %c0_i32 : i32, i32
  }
  func.func @transform_1(%arg0: i32) -> (i32, i32) {
    %c0_i32 = arith.constant 0 : i32
    %c0_i32_0 = arith.constant 0 : i32
    %c0_i32_1 = arith.constant 0 : i32
    return %c0_i32, %c0_i32_0 : i32, i32
  }
  func.func @transform_2(%arg0: i32) -> (i32, i32) {
    %c0_i32 = arith.constant 0 : i32
    %c0_i32_0 = arith.constant 0 : i32
    %c0_i32_1 = arith.constant 0 : i32
    return %c0_i32, %c0_i32_0 : i32, i32
  }
  func.func @transform_3(%arg0: i32) -> (i32, i32) {
    %c0_i32 = arith.constant 0 : i32
    %c0_i32_0 = arith.constant 0 : i32
    %c0_i32_1 = arith.constant 0 : i32
    return %c0_i32, %c0_i32_0 : i32, i32
  }
  func.func @transform_4(%arg0: i32) -> (i32, i32) {
    %c0_i32 = arith.constant 0 : i32
    %c0_i32_0 = arith.constant 0 : i32
    %c0_i32_1 = arith.constant 0 : i32
    return %c0_i32, %c0_i32_0 : i32, i32
  }
  func.func @transform_5(%arg0: i32) -> (i32, i32) {
    %c0_i32 = arith.constant 0 : i32
    %c0_i32_0 = arith.constant 0 : i32
    %c0_i32_1 = arith.constant 0 : i32
    return %c0_i32, %c0_i32_0 : i32, i32
  }
  func.func @transform_6(%arg0: i32) -> (i32, i32) {
    %c0_i32 = arith.constant 0 : i32
    %c0_i32_0 = arith.constant 0 : i32
    %c0_i32_1 = arith.constant 0 : i32
    return %c0_i32, %c0_i32_0 : i32, i32
  }
  func.func @transform_7(%arg0: i32) -> (i32, i32) {
    %c0_i32 = arith.constant 0 : i32
    %c0_i32_0 = arith.constant 0 : i32
    %c0_i32_1 = arith.constant 0 : i32
    return %c0_i32, %c0_i32_0 : i32, i32
  }
  func.func @transform_8(%arg0: i32) -> (i32, i32) {
    %c0_i32 = arith.constant 0 : i32
    %c0_i32_0 = arith.constant 0 : i32
    %c0_i32_1 = arith.constant 0 : i32
    return %c0_i32, %c0_i32_0 : i32, i32
  }
  func.func @transform_9(%arg0: i32) -> (i32, i32) {
    %c0_i32 = arith.constant 0 : i32
    %c0_i32_0 = arith.constant 0 : i32
    return %c0_i32, %arg0 : i32, i32
  }
}

</mosaic_0001>

<bundles_post_ra>
// kernel: tpu_custom_call.1
= control target key start
LH: loop header
LB: loop body
LE: loop exit
PB: predicated region body
PF: predicated region fallthrough
CT: control target
= control target key end

     0   :  { %s1985_s0 = inlined_call_operand.hbm [shape: f32[8,225], index: 0, kind: input, shape index: {}]   ;;  %s1986_s1 = inlined_call_operand.hbm [shape: bf16[225,512], index: 1, kind: input, shape index: {}]   ;;  %s1987_s2 = inlined_call_operand.vmem [shape: bf16[1,512], index: 2, kind: input, shape index: {}]   ;;  %s1988_s3 = inlined_call_operand.hbm [shape: bf16[512,256], index: 3, kind: input, shape index: {}]   ;;  %s1989_s4 = inlined_call_operand.vmem [shape: bf16[1,256], index: 4, kind: input, shape index: {}]   ;;  %s1990_s5 = inlined_call_operand.hbm [shape: bf16[256,128], index: 5, kind: input, shape index: {}]   ;;  %s1991_s6 = inlined_call_operand.vmem [shape: bf16[1,128], index: 6, kind: input, shape index: {}]   ;;  %s1992_s7 = inlined_call_operand.vmem [shape: bf16[1,128], index: 7, kind: input, shape index: {}]   ;;  %s1993_s8 = inlined_call_operand.<no memory space> [shape: f32[1,1], index: 8, kind: input, shape index: {}]   ;;  %s1994_s9 = inlined_call_operand.hbm [shape: f32[1,8], index: 9, kind: output, shape index: {}]  }
   0x1   :  { %v14_v0 = vstv %s1993_s8 }
   0x2   :  { %15 = vst [vmem:[#allocation2] sm:$0x1] %v14_v0 }
   0x3   :  { %16 = vsyncpa [#allocation4], 0 }
   0x4   :  { %17 = vsyncpa [#allocation7], 0 }
   0x5   :  { %18 = vsyncpa [#allocation10], 0 }
   0x6   :  { %19 = vsyncpa [#allocation5], 0  ;;  %s1865_s11 = smov [#allocation6]  }
   0x7   :  { %s35_s12 = sshll.u32 %s1865_s11, 4  ;;  %s36_s12 = int_to_ptr.vmem [resolvable:$true] %s35_s12 }
   0x8   :  { %s1765_s13 = scalar_lea.vmem %s36_s12, 7424  ;;  %p1770_p1 = scmp.lt.s32.totalorder %s36_s12, %s36_s12 }
   0x9   :  { %p1766_p0 = scmp.ne.s32.totalorder %s36_s12, %s1765_s13  ;;  %p1771_p2 = scmp.lt.s32.totalorder %s1765_s13, %s1765_s13 }
   0xb   :  { %p1772_p3 = por %p1771_p2, %p1770_p1 }
   0xd   :  { %p1773_p4 = pnand %p1772_p3, %p1766_p0 }
   0xf   :  { %1776 = shalt.err (!%p1773_p4)
}
  0x10   :  { %s1866_s14 = smov 256   ;;  %s1867_s15 = smov 16  }
  0x11   :  { %41 = dma.hbm_to_vmem [thread:$0]  %s1986_s1, 7424, %s36_s12, [#allocation7], %s1866_s14, %s1866_s14, %s1867_s15  }
  0x12   :  { %s1868_s8 = smov [#allocation3]   ;;  %s1869_s19 = smov [#allocation8]  }
  0x13   :  { %s26_s18 = sshll.u32 %s1868_s8, 4  ;;  %s49_s20 = sshll.u32 %s1869_s19, 4  ;;  %s27_s18 = int_to_ptr.vmem [resolvable:$true] %s26_s18  ;;  %s50_s20 = int_to_ptr.vmem [resolvable:$true] %s49_s20 }
  0x14   :  { %s1785_s21 = scalar_lea.vmem %s27_s18, 256  ;;  %p1790_p6 = scmp.lt.s32.totalorder %s27_s18, %s27_s18 }
  0x15   :  { %p1786_p5 = scmp.ne.s32.totalorder %s27_s18, %s1785_s21  ;;  %p1791_p7 = scmp.lt.s32.totalorder %s1785_s21, %s1785_s21 }
  0x17   :  { %p1792_p8 = por %p1791_p7, %p1790_p6 }
  0x19   :  { %p1793_p9 = pnand %p1792_p8, %p1786_p5 }
  0x1b   :  { %1796 = shalt.err (!%p1793_p9)
}
  0x1c   :  { %29 = dma.hbm_to_vmem [thread:$0]  %s1985_s0, 256, %s27_s18, [#allocation4]  }
  0x1d   :  { %s1805_s24 = scalar_lea.vmem %s50_s20, 8192  ;;  %p1810_p11 = scmp.lt.s32.totalorder %s50_s20, %s50_s20 }
  0x1e   :  { %p1806_p10 = scmp.ne.s32.totalorder %s50_s20, %s1805_s24  ;;  %p1811_p12 = scmp.lt.s32.totalorder %s1805_s24, %s1805_s24 }
  0x20   :  { %p1812_p13 = por %p1811_p12, %p1810_p11 }
  0x22   :  { %p1813_p0 = pnand %p1812_p13, %p1806_p10 }
  0x24   :  { %1816 = shalt.err (!%p1813_p0)
}
  0x25   :  { %s1870_s1 = smov 128   ;;  %s1871_s25 = smov 8  }
  0x26   :  { %55 = dma.hbm_to_vmem [thread:$0]  %s1988_s3, 8192, %s50_s20, [#allocation7], %s1870_s1, %s1870_s1, %s1871_s25  }
  0x27   :  { %s1872_s28 = smov [#allocation9]  }
  0x28   :  { %s63_s29 = sshll.u32 %s1872_s28, 4  ;;  %s64_s29 = int_to_ptr.vmem [resolvable:$true] %s63_s29 }
  0x29   :  { %s1825_s30 = scalar_lea.vmem %s64_s29, 2048  ;;  %p1830_p2 = scmp.lt.s32.totalorder %s64_s29, %s64_s29 }
  0x2a   :  { %p1826_p1 = scmp.ne.s32.totalorder %s64_s29, %s1825_s30  ;;  %p1831_p3 = scmp.lt.s32.totalorder %s1825_s30, %s1825_s30 }
  0x2c   :  { %p1832_p4 = por %p1831_p3, %p1830_p2 }
  0x2e   :  { %p1833_p5 = pnand %p1832_p4, %p1826_p1 }
  0x30   :  { %1836 = shalt.err (!%p1833_p5)
}
  0x31   :  { %s1873_s0 = smov 64   ;;  %s1874_s10 = smov 4  }
  0x32   :  { %69 = dma.hbm_to_vmem [thread:$0]  %s1990_s5, 2048, %s64_s29, [#allocation10], %s1873_s0, %s1873_s0, %s1874_s10  }
  0x33   :  { %1857 = dma.done.wait [#allocation4], 256  }
  0x34   :  { %1858 = vsyncadd [#allocation4], 4294967040 }
  0x35   :  { %1859 = dma.done.wait [#allocation7], 15616  }
  0x36   :  { %1860 = vsyncadd [#allocation7], 4294951680 }
  0x37   :  { %1861 = dma.done.wait [#allocation10], 2048  }
  0x38   :  { %1862 = vsyncadd [#allocation10], 4294965248  ;;  %v1875_v1 = vmov 0   ;;  %v1557_v2 = vld [vmem:[#allocation6 + $0xe4] ss:$16 sps:$4 sm:$0xff]   ;;  %vm445_vm0 = vcmask 1040384  }
  0x39   :  { %1556 = vset.pattern.permute.xlu0 %v1875_v1  ;;  %v1559_v3 = vld [vmem:[#allocation6 + $0xec] ss:$16 sps:$4 sm:$0xff]   ;;  %460 = vmatprep.subr.bf16.mxu0 %v1557_v2  ;;  %v1561_v4 = vld [vmem:[#allocation6 + $0xe0] ss:$16 sps:$4 sm:$0xff]   ;;  %v1562_v5 = vld [vmem:[#allocation6 + $0xe8] ss:$16 sps:$4 sm:$0xff]  }
  0x3a   :  { %501 = vmatprep.subr.bf16.mxu1 %v1559_v3  ;;  %v1563_v6 = vld [vmem:[#allocation6 + $0xc4] ss:$16 sps:$4 sm:$0xff]   ;;  %461 = vmatpush1.bf16.msra.mxu0 %v1561_v4  ;;  %v1565_v7 = vld [vmem:[#allocation6 + $0xcc] ss:$16 sps:$4 sm:$0xff]   ;;  %v1567_v8 = vld [vmem:[#allocation6 + $0xc0] ss:$16 sps:$4 sm:$0xff]  }
  0x3b   :  { %502 = vmatpush1.bf16.msra.mxu1 %v1562_v5  ;;  %462 = vmatprep.subr.bf16.mxu0 %v1563_v6  ;;  %v1568_v9 = vld [vmem:[#allocation6 + $0xc8] ss:$16 sps:$4 sm:$0xff]   ;;  %v1569_v10 = vld [vmem:[#allocation6 + $0xa4] ss:$16 sps:$4 sm:$0xff]   ;;  %v1571_v11 = vld [vmem:[#allocation6 + $0xac] ss:$16 sps:$4 sm:$0xff]  }
  0x3c   :  { %503 = vmatprep.subr.bf16.mxu1 %v1565_v7  ;;  %v1573_v12 = vld [vmem:[#allocation6 + $0xa0] ss:$16 sps:$4 sm:$0xff]   ;;  %v1574_v13 = vld [vmem:[#allocation6 + $0xa8] ss:$16 sps:$4 sm:$0xff]   ;;  %v1575_v14 = vld [vmem:[#allocation6 + $0x84] ss:$16 sps:$4 sm:$0xff]  }
  0x3d   :  { %v1577_v15 = vld [vmem:[#allocation6 + $0x8c] ss:$16 sps:$4 sm:$0xff]   ;;  %v1579_v16 = vld [vmem:[#allocation6 + $0x80] ss:$16 sps:$4 sm:$0xff]   ;;  %v1580_v17 = vld [vmem:[#allocation6 + $0x88] ss:$16 sps:$4 sm:$0xff]  }
  0x3e   :  { %463 = vmatpush1.bf16.msra.mxu0 %v1567_v8  ;;  %v1581_v18 = vld [vmem:[#allocation6 + $0x64] ss:$16 sps:$4 sm:$0xff]   ;;  %v1583_v19 = vld [vmem:[#allocation6 + $0x6c] ss:$16 sps:$4 sm:$0xff]   ;;  %v1585_v20 = vld [vmem:[#allocation6 + $0x60] ss:$16 sps:$4 sm:$0xff]  }
  0x3f   :  { %504 = vmatpush1.bf16.msra.mxu1 %v1568_v9  ;;  %464 = vmatprep.subr.bf16.mxu0 %v1569_v10  ;;  %v1586_v21 = vld [vmem:[#allocation6 + $0x68] ss:$16 sps:$4 sm:$0xff]   ;;  %v1587_v22 = vld [vmem:[#allocation6 + $0x44] ss:$16 sps:$4 sm:$0xff]   ;;  %v1589_v23 = vld [vmem:[#allocation6 + $0x4c] ss:$16 sps:$4 sm:$0xff]  }
  0x40   :  { %505 = vmatprep.subr.bf16.mxu1 %v1571_v11  ;;  %v1591_v24 = vld [vmem:[#allocation6 + $0x40] ss:$16 sps:$4 sm:$0xff]   ;;  %v1592_v25 = vld [vmem:[#allocation6 + $0x48] ss:$16 sps:$4 sm:$0xff]   ;;  %v1593_v26 = vld [vmem:[#allocation6 + $0x24] ss:$16 sps:$4 sm:$0xff]  }
  0x41   :  { %v1595_v27 = vld [vmem:[#allocation6 + $0x2c] ss:$16 sps:$4 sm:$0xff]   ;;  %v149_v28 = vld [vmem:[#allocation6 + $0x1c0] sm:$0x11]  ;;  %v1598_v31 = vld [vmem:[#allocation6 + $0x28] ss:$16 sps:$4 sm:$0xff]  }
  0x42   :  { %465 = vmatpush1.bf16.msra.mxu0 %v1573_v12  ;;  %v150_v29 = vld [vmem:[#allocation6 + $0x1c8] sm:$0x11]  ;;  %v1597_v30 = vld [vmem:[#allocation6 + $0x20] ss:$16 sps:$4 sm:$0xff]   ;;  %v1599_v32 = vld [vmem:[#allocation6 + $0x4] ss:$16 sps:$4 sm:$0xff]   ;;  %v1424_v34 = vcombine.high %v149_v28, %v149_v28  ;;  %v1423_v39 = vcombine.low %v149_v28, %v149_v28 }
  0x43   :  { %506 = vmatpush1.bf16.msra.mxu1 %v1574_v13  ;;  %466 = vmatprep.subr.bf16.mxu0 %v1575_v14  ;;  %v1601_v33 = vld [vmem:[#allocation6 + $0xc] ss:$16 sps:$4 sm:$0xff]   ;;  %v1426_v35 = vcombine.high %v150_v29, %v150_v29  ;;  %v447_v36 = vsel %vm445_vm0, 65535, %v1875_v1  ;;  %v1603_v37 = vld [vmem:[#allocation6] ss:$16 sps:$4 sm:$0xff]   ;;  %v1425_v40 = vcombine.low %v150_v29, %v150_v29  ;;  %vm441_vm1 = vcmask 793600  }
  0x44   :  { %507 = vmatprep.subr.bf16.mxu1 %v1577_v15  ;;  %v1604_v38 = vld [vmem:[#allocation6 + $0x8] ss:$16 sps:$4 sm:$0xff]   ;;  %v452_v41 = vand.u32 %v1424_v34, %v447_v36  ;;  %v449_v43 = vand.u32 %v1423_v39, %v447_v36  ;;  %v1609_v45 = vld [vmem:[#allocation6 + $0x1a4] ss:$16 sps:$4 sm:$0xff]   ;;  %v1611_v46 = vld [vmem:[#allocation6 + $0x1ac] ss:$16 sps:$4 sm:$0xff]  }
  0x45   :  { %v458_v42 = vand.u32 %v1426_v35, %v447_v36  ;;  %v455_v44 = vand.u32 %v1425_v40, %v447_v36  ;;  %v1613_v47 = vld [vmem:[#allocation6 + $0x1a0] ss:$16 sps:$4 sm:$0xff]   ;;  %v1614_v48 = vld [vmem:[#allocation6 + $0x1a8] ss:$16 sps:$4 sm:$0xff]   ;;  %v1615_v49 = vld [vmem:[#allocation6 + $0x184] ss:$16 sps:$4 sm:$0xff]  }
  0x46   :  { %467 = vmatpush1.bf16.msra.mxu0 %v1579_v16  ;;  %v1617_v50 = vld [vmem:[#allocation6 + $0x18c] ss:$16 sps:$4 sm:$0xff]   ;;  %v1619_v52 = vld [vmem:[#allocation6 + $0x180] ss:$16 sps:$4 sm:$0xff]   ;;  %v1620_v53 = vld [vmem:[#allocation6 + $0x188] ss:$16 sps:$4 sm:$0xff]  }
  0x47   :  { %508 = vmatpush1.bf16.msra.mxu1 %v1580_v17  ;;  %468 = vmatprep.subr.bf16.mxu0 %v1581_v18  ;;  %v90_v51 = vld [vmem:[#allocation3 + $0x8] sm:$0xff]  ;;  %v1621_v55 = vld [vmem:[#allocation6 + $0x164] ss:$16 sps:$4 sm:$0xff]   ;;  %v1625_v57 = vld [vmem:[#allocation6 + $0x160] ss:$16 sps:$4 sm:$0xff]   ;;  %vm1878_vm2 = vmmov 0  }
  0x48   :  { %509 = vmatprep.subr.bf16.mxu1 %v1583_v19  ;;  %v92_v54 = vpack.c.bf16 %v90_v51, %v90_v51  ;;  %v1623_v56 = vld [vmem:[#allocation6 + $0x16c] ss:$16 sps:$4 sm:$0xff]   ;;  %v1626_v58 = vld [vmem:[#allocation6 + $0x168] ss:$16 sps:$4 sm:$0xff]   ;;  %v1627_v59 = vld [vmem:[#allocation6 + $0x144] ss:$16 sps:$4 sm:$0xff]  }
  0x49   :  { %v1629_v60 = vld [vmem:[#allocation6 + $0x14c] ss:$16 sps:$4 sm:$0xff]   ;;  %v1631_v61 = vld [vmem:[#allocation6 + $0x140] ss:$16 sps:$4 sm:$0xff]   ;;  %v1632_v62 = vld [vmem:[#allocation6 + $0x148] ss:$16 sps:$4 sm:$0xff]  }
  0x4a   :  { %469 = vmatpush1.bf16.msra.mxu0 %v1585_v20  ;;  %1427 = vmatprep.mubr.msk.bf16.mxu0 %vm441_vm1, %v92_v54  ;;  %v1633_v63 = vld [vmem:[#allocation6 + $0x124] ss:$16 sps:$4 sm:$0xff]   ;;  %v1635_v0 = vld [vmem:[#allocation6 + $0x12c] ss:$16 sps:$4 sm:$0xff]   ;;  %v1637_v2 = vld [vmem:[#allocation6 + $0x120] ss:$16 sps:$4 sm:$0xff]  }
  0x4b   :  { %510 = vmatpush1.bf16.msra.mxu1 %v1586_v21  ;;  %470 = vmatprep.subr.bf16.mxu0 %v1587_v22  ;;  %v1638_v3 = vld [vmem:[#allocation6 + $0x128] ss:$16 sps:$4 sm:$0xff]   ;;  %v1639_v4 = vld [vmem:[#allocation6 + $0x104] ss:$16 sps:$4 sm:$0xff]   ;;  %v1641_v5 = vld [vmem:[#allocation6 + $0x10c] ss:$16 sps:$4 sm:$0xff]  }
  0x4c   :  { %511 = vmatprep.subr.bf16.mxu1 %v1589_v23  ;;  %1428 = vmatprep.mubr.msk.bf16.mxu1 %vm441_vm1, %v92_v54  ;;  %v1643_v6 = vld [vmem:[#allocation6 + $0x100] ss:$16 sps:$4 sm:$0xff]   ;;  %v1644_v7 = vld [vmem:[#allocation6 + $0x108] ss:$16 sps:$4 sm:$0xff]   ;;  %v1647_v9 = vld [vmem:[#allocation8 + $0x74] ss:$8 sps:$4 sm:$0xff]  }
  0x4d   :  { %v89_v8 = vld [vmem:[#allocation3] sm:$0xff]  ;;  %v1650_v10 = vld [vmem:[#allocation8 + $0x174] ss:$8 sps:$4 sm:$0xff]   ;;  %v1645_v12 = vld [vmem:[#allocation8 + $0x70] ss:$8 sps:$4 sm:$0xff]   ;;  %vm1348_vm3 = vcmask 57344  }
  0x4e   :  { %471 = vmatpush1.bf16.msra.mxu0 %v1591_v24  ;;  %v91_v11 = vpack.c.bf16 %v89_v8, %v89_v8  ;;  %v1648_v13 = vld [vmem:[#allocation8 + $0x170] ss:$8 sps:$4 sm:$0xff]   ;;  %v1653_v14 = vld [vmem:[#allocation8 + $0x64] ss:$8 sps:$4 sm:$0xff]   ;;  %v1651_v16 = vld [vmem:[#allocation8 + $0x60] ss:$8 sps:$4 sm:$0xff]  }
  0x4f   :  { %512 = vmatpush1.bf16.msra.mxu1 %v1592_v25  ;;  %472 = vmatprep.subr.bf16.mxu0 %v1593_v26  ;;  %v1656_v15 = vld [vmem:[#allocation8 + $0x164] ss:$8 sps:$4 sm:$0xff]   ;;  %v1654_v17 = vld [vmem:[#allocation8 + $0x160] ss:$8 sps:$4 sm:$0xff]   ;;  %v1659_v18 = vld [vmem:[#allocation8 + $0x54] ss:$8 sps:$4 sm:$0xff]  }
  0x50   :  { %513 = vmatprep.subr.bf16.mxu1 %v1595_v27  ;;  %v1662_v19 = vld [vmem:[#allocation8 + $0x154] ss:$8 sps:$4 sm:$0xff]   ;;  %v1657_v20 = vld [vmem:[#allocation8 + $0x50] ss:$8 sps:$4 sm:$0xff]   ;;  %v1665_v22 = vld [vmem:[#allocation8 + $0x44] ss:$8 sps:$4 sm:$0xff]  }
  0x51   :  { %v1660_v21 = vld [vmem:[#allocation8 + $0x150] ss:$8 sps:$4 sm:$0xff]   ;;  %v1668_v23 = vld [vmem:[#allocation8 + $0x144] ss:$8 sps:$4 sm:$0xff]   ;;  %v1663_v24 = vld [vmem:[#allocation8 + $0x40] ss:$8 sps:$4 sm:$0xff]  }
  0x52   :  { %473 = vmatpush1.bf16.msra.mxu0 %v1597_v30  ;;  %v1666_v25 = vld [vmem:[#allocation8 + $0x140] ss:$8 sps:$4 sm:$0xff]   ;;  %v1671_v26 = vld [vmem:[#allocation8 + $0x34] ss:$8 sps:$4 sm:$0xff]   ;;  %v1669_v28 = vld [vmem:[#allocation8 + $0x30] ss:$8 sps:$4 sm:$0xff]  }
  0x53   :  { %514 = vmatpush1.bf16.msra.mxu1 %v1598_v31  ;;  %474 = vmatprep.subr.bf16.mxu0 %v1599_v32  ;;  %v1674_v27 = vld [vmem:[#allocation8 + $0x134] ss:$8 sps:$4 sm:$0xff]   ;;  %v1672_v29 = vld [vmem:[#allocation8 + $0x130] ss:$8 sps:$4 sm:$0xff]   ;;  %v1677_v30 = vld [vmem:[#allocation8 + $0x24] ss:$8 sps:$4 sm:$0xff]  }
  0x54   :  { %515 = vmatprep.subr.bf16.mxu1 %v1601_v33  ;;  %v1680_v31 = vld [vmem:[#allocation8 + $0x124] ss:$8 sps:$4 sm:$0xff]   ;;  %v1675_v32 = vld [vmem:[#allocation8 + $0x20] ss:$8 sps:$4 sm:$0xff]   ;;  %v1683_v34 = vld [vmem:[#allocation8 + $0x14] ss:$8 sps:$4 sm:$0xff]  }
  0x55   :  { %v1678_v33 = vld [vmem:[#allocation8 + $0x120] ss:$8 sps:$4 sm:$0xff]   ;;  %v1686_v35 = vld [vmem:[#allocation8 + $0x114] ss:$8 sps:$4 sm:$0xff]   ;;  %v1681_v36 = vld [vmem:[#allocation8 + $0x10] ss:$8 sps:$4 sm:$0xff]  }
  0x56   :  { %475 = vmatpush1.bf16.msra.mxu0 %v1603_v37  ;;  %v1684_v37 = vld [vmem:[#allocation8 + $0x110] ss:$8 sps:$4 sm:$0xff]   ;;  %v1692_v39 = vld [vmem:[#allocation8 + $0x104] ss:$8 sps:$4 sm:$0xff]   ;;  %v1687_v40 = vld [vmem:[#allocation8] ss:$8 sps:$4 sm:$0xff]  }
  0x57   :  { %516 = vmatpush1.bf16.msra.mxu1 %v1604_v38  ;;  %478 = vmatprep.subr.bf16.mxu0 %v452_v41  ;;  %v1689_v38 = vld [vmem:[#allocation8 + $0x4] ss:$8 sps:$4 sm:$0xff]   ;;  %v1690_v41 = vld [vmem:[#allocation8 + $0x100] ss:$8 sps:$4 sm:$0xff]   ;;  %v1710_v51 = vld [vmem:[#allocation8 + $0x1d4] ss:$8 sps:$4 sm:$0xff]  }
  0x58   :  { %519 = vmatprep.subr.bf16.mxu1 %v458_v42  ;;  %v1695_v42 = vld [vmem:[#allocation8 + $0xf4] ss:$8 sps:$4 sm:$0xff]   ;;  %v1713_v54 = vld [vmem:[#allocation8 + $0xc4] ss:$8 sps:$4 sm:$0xff]  }
  0x59   :  { %v1740_v8 = vld [vmem:[#allocation8 + $0x184] ss:$8 sps:$4 sm:$0xff]  }
  0x5a   :  { %479 = vmatpush2.bf16.msra.mxu0 %v449_v43  ;;  %v1698_v43 = vld [vmem:[#allocation8 + $0x1f4] ss:$8 sps:$4 sm:$0xff]  }
  0x5b   :  { %520 = vmatpush2.bf16.msra.mxu1 %v455_v44  ;;  %480 = vmatprep.subr.bf16.mxu0 %v1609_v45  ;;  %v1693_v44 = vld [vmem:[#allocation8 + $0xf0] ss:$8 sps:$4 sm:$0xff]  }
  0x5c   :  { %521 = vmatprep.subr.bf16.mxu1 %v1611_v46  ;;  %v1696_v45 = vld [vmem:[#allocation8 + $0x1f0] ss:$8 sps:$4 sm:$0xff]   ;;  %v1701_v46 = vld [vmem:[#allocation8 + $0xe4] ss:$8 sps:$4 sm:$0xff]  }
  0x5e   :  { %481 = vmatpush2.bf16.msra.mxu0 %v1613_v47  ;;  %v1704_v47 = vld [vmem:[#allocation8 + $0x1e4] ss:$8 sps:$4 sm:$0xff]  }
  0x5f   :  { %522 = vmatpush2.bf16.msra.mxu1 %v1614_v48  ;;  %482 = vmatprep.subr.bf16.mxu0 %v1615_v49  ;;  %v1699_v48 = vld [vmem:[#allocation8 + $0xe0] ss:$8 sps:$4 sm:$0xff]  }
  0x60   :  { %523 = vmatprep.subr.bf16.mxu1 %v1617_v50  ;;  %v1702_v49 = vld [vmem:[#allocation8 + $0x1e0] ss:$8 sps:$4 sm:$0xff]   ;;  %v1707_v50 = vld [vmem:[#allocation8 + $0xd4] ss:$8 sps:$4 sm:$0xff]  }
  0x62   :  { %483 = vmatpush2.bf16.msra.mxu0 %v1619_v52  ;;  %v1705_v52 = vld [vmem:[#allocation8 + $0xd0] ss:$8 sps:$4 sm:$0xff]  }
  0x63   :  { %524 = vmatpush2.bf16.msra.mxu1 %v1620_v53  ;;  %484 = vmatprep.subr.bf16.mxu0 %v1621_v55  ;;  %v1708_v53 = vld [vmem:[#allocation8 + $0x1d0] ss:$8 sps:$4 sm:$0xff]   ;;  %v1716_v55 = vld [vmem:[#allocation8 + $0x1c4] ss:$8 sps:$4 sm:$0xff]  }
  0x64   :  { %525 = vmatprep.subr.bf16.mxu1 %v1623_v56  ;;  %v1711_v56 = vld [vmem:[#allocation8 + $0xc0] ss:$8 sps:$4 sm:$0xff]  }
  0x66   :  { %485 = vmatpush2.bf16.msra.mxu0 %v1625_v57  ;;  %v1714_v57 = vld [vmem:[#allocation8 + $0x1c0] ss:$8 sps:$4 sm:$0xff]  }
  0x67   :  { %526 = vmatpush2.bf16.msra.mxu1 %v1626_v58  ;;  %486 = vmatprep.subr.bf16.mxu0 %v1627_v59  ;;  %v1719_v58 = vld [vmem:[#allocation8 + $0xb4] ss:$8 sps:$4 sm:$0xff]  }
  0x68   :  { %527 = vmatprep.subr.bf16.mxu1 %v1629_v60  ;;  %v1722_v59 = vld [vmem:[#allocation8 + $0x1b4] ss:$8 sps:$4 sm:$0xff]   ;;  %v1717_v60 = vld [vmem:[#allocation8 + $0xb0] ss:$8 sps:$4 sm:$0xff]  }
  0x6a   :  { %487 = vmatpush2.bf16.msra.mxu0 %v1631_v61  ;;  %v1720_v61 = vld [vmem:[#allocation8 + $0x1b0] ss:$8 sps:$4 sm:$0xff]  }
  0x6b   :  { %528 = vmatpush2.bf16.msra.mxu1 %v1632_v62  ;;  %488 = vmatprep.subr.bf16.mxu0 %v1633_v63  ;;  %v1725_v62 = vld [vmem:[#allocation8 + $0xa4] ss:$8 sps:$4 sm:$0xff]  }
  0x6c   :  { %529 = vmatprep.subr.bf16.mxu1 %v1635_v0  ;;  %v1728_v63 = vld [vmem:[#allocation8 + $0x1a4] ss:$8 sps:$4 sm:$0xff]   ;;  %v1723_v0 = vld [vmem:[#allocation8 + $0xa0] ss:$8 sps:$4 sm:$0xff]  }
  0x6e   :  { %489 = vmatpush2.bf16.msra.mxu0 %v1637_v2  ;;  %v1726_v2 = vld [vmem:[#allocation8 + $0x1a0] ss:$8 sps:$4 sm:$0xff]  }
  0x6f   :  { %530 = vmatpush2.bf16.msra.mxu1 %v1638_v3  ;;  %490 = vmatprep.subr.bf16.mxu0 %v1639_v4  ;;  %v1731_v3 = vld [vmem:[#allocation8 + $0x94] ss:$8 sps:$4 sm:$0xff]  }
  0x70   :  { %531 = vmatprep.subr.bf16.mxu1 %v1641_v5  ;;  %v1734_v4 = vld [vmem:[#allocation8 + $0x194] ss:$8 sps:$4 sm:$0xff]   ;;  %v1729_v5 = vld [vmem:[#allocation8 + $0x90] ss:$8 sps:$4 sm:$0xff]  }
  0x72   :  { %491 = vmatpush2.bf16.msra.mxu0 %v1643_v6  ;;  %v1732_v6 = vld [vmem:[#allocation8 + $0x190] ss:$8 sps:$4 sm:$0xff]  }
  0x73   :  { %532 = vmatpush2.bf16.msra.mxu1 %v1644_v7  ;;  %992 = vmatprep.subr.bf16.mxu0 %v1647_v9  ;;  %v1737_v7 = vld [vmem:[#allocation8 + $0x84] ss:$8 sps:$4 sm:$0xff]   ;;  %v1735_v9 = vld [vmem:[#allocation8 + $0x80] ss:$8 sps:$4 sm:$0xff]  }
  0x74   :  { %1033 = vmatprep.subr.bf16.mxu1 %v1650_v10  ;;  %v1738_v10 = vld [vmem:[#allocation8 + $0x180] ss:$8 sps:$4 sm:$0xff]  }
  0x75   :  { %493 = vmatmul.mubr.bf16.vlgmr.msra.gmra.mxu0 %v91_v11 }
  0x76   :  { %534 = vmatmul.mubr.bf16.vlgmr.msra.gmra.mxu1 %v91_v11  ;;  %993 = vmatpush1.bf16.msra.mxu0 %v1645_v12  ;;  %v1741_v11 = vld [vmem:[#allocation9 + $0x78] sm:$0xff]   ;;  %v1876_v12 = vmov 1966171168  }
  0x77   :  { %1034 = vmatpush1.bf16.msra.mxu1 %v1648_v13  ;;  %994 = vmatprep.subr.bf16.mxu0 %v1653_v14  ;;  %v557_v13 = vunpack.c.l.s4 %v1876_v12  ;;  %v559_v14 = vlaneseq }
  0x78   :  { %1035 = vmatprep.subr.bf16.mxu1 %v1656_v15 }
  0x79   :  { %v558_v15 = vunpack.c.0.s8 %v557_v13 }
  0x7a   :  { %995 = vmatpush1.bf16.msra.mxu0 %v1651_v16  ;;  %v560_v16 = vshrl.u32 %v559_v14, 7 }
  0x7b   :  { %1036 = vmatpush1.bf16.msra.mxu1 %v1654_v17  ;;  %996 = vmatprep.subr.bf16.mxu0 %v1659_v18  ;;  %v1429_v17 = vld.sshfl [vmem:[%s1987_s2] sm:$0x33 pattern:$0x75316420] }
  0x7c   :  { %1037 = vmatprep.subr.bf16.mxu1 %v1662_v19  ;;  %v1950_v18 = vsub.s32 %v558_v15, %v560_v16  ;;  %v555_v19 = vcombine.high %v1429_v17, %v1429_v17 }
  0x7e   :  { %997 = vmatpush1.bf16.msra.mxu0 %v1657_v20  ;;  %v562_v20 = vrot.slane %v1429_v17, %v1950_v18 }
  0x7f   :  { %1038 = vmatpush1.bf16.msra.mxu1 %v1660_v21  ;;  %998 = vmatprep.subr.bf16.mxu0 %v1665_v22  ;;  %v569_v21 = vrot.slane %v555_v19, %v1950_v18 }
  0x80   :  { %1039 = vmatprep.subr.bf16.mxu1 %v1668_v23  ;;  %v570_v22 = vcombine.high %v562_v20, %v562_v20 }
  0x81   :  { %v571_v23 = vcombine.high %v569_v21, %v569_v21 }
  0x82   :  { %999 = vmatpush1.bf16.msra.mxu0 %v1663_v24  ;;  %v573_v24 = vpack.i.b16 %v562_v20, %v562_v20 }
  0x83   :  { %1040 = vmatpush1.bf16.msra.mxu1 %v1666_v25  ;;  %1000 = vmatprep.subr.bf16.mxu0 %v1671_v26  ;;  %v1954_v25 = vsub.s32 0, %v560_v16  ;;  %v587_v26 = vpack.i.b16 %v570_v22, %v570_v22 }
  0x84   :  { %1041 = vmatprep.subr.bf16.mxu1 %v1674_v27  ;;  %v580_v27 = vpack.i.b16 %v569_v21, %v569_v21 }
  0x86   :  { %1001 = vmatpush1.bf16.msra.mxu0 %v1669_v28  ;;  %v594_v28 = vpack.i.b16 %v571_v23, %v571_v23 }
  0x87   :  { %1042 = vmatpush1.bf16.msra.mxu1 %v1672_v29  ;;  %1002 = vmatprep.subr.bf16.mxu0 %v1677_v30  ;;  %v578_v30 = vrot.slane %v573_v24, %v1954_v25 }
  0x88   :  { %1043 = vmatprep.subr.bf16.mxu1 %v1680_v31 }
  0x8a   :  { %1003 = vmatpush1.bf16.msra.mxu0 %v1675_v32  ;;  %v592_v32 = vrot.slane %v587_v26, %v1954_v25 }
  0x8b   :  { %1044 = vmatpush1.bf16.msra.mxu1 %v1678_v33  ;;  %1004 = vmatprep.subr.bf16.mxu0 %v1683_v34 }
  0x8c   :  { %1045 = vmatprep.subr.bf16.mxu1 %v1686_v35  ;;  %v585_v35 = vrot.slane %v580_v27, %v1954_v25 }
  0x8e   :  { %1005 = vmatpush1.bf16.msra.mxu0 %v1681_v36  ;;  %v599_v36 = vrot.slane %v594_v28, %v1954_v25 }
  0x8f   :  { %1046 = vmatpush1.bf16.msra.mxu1 %v1684_v37  ;;  %1006 = vmatprep.subr.bf16.mxu0 %v1689_v38 }
  0x90   :  { %1047 = vmatprep.subr.bf16.mxu1 %v1692_v39 }
  0x92   :  { %1007 = vmatpush1.bf16.msra.mxu0 %v1687_v40 }
  0x93   :  { %1048 = vmatpush1.bf16.msra.mxu1 %v1690_v41  ;;  %1008 = vmatprep.subr.bf16.mxu0 %v1695_v42 }
  0x94   :  { %1049 = vmatprep.subr.bf16.mxu1 %v1698_v43 }
  0x96   :  { %1009 = vmatpush2.bf16.msra.mxu0 %v1693_v44 }
  0x97   :  { %1050 = vmatpush2.bf16.msra.mxu1 %v1696_v45  ;;  %1010 = vmatprep.subr.bf16.mxu0 %v1701_v46 }
  0x98   :  { %1051 = vmatprep.subr.bf16.mxu1 %v1704_v47 }
  0x9a   :  { %1011 = vmatpush2.bf16.msra.mxu0 %v1699_v48 }
  0x9b   :  { %1052 = vmatpush2.bf16.msra.mxu1 %v1702_v49  ;;  %1012 = vmatprep.subr.bf16.mxu0 %v1707_v50 }
  0x9c   :  { %1053 = vmatprep.subr.bf16.mxu1 %v1710_v51  ;;  %v1742_v51 = vld [vmem:[#allocation9 + $0x38] sm:$0xff]  }
  0x9e   :  { %1013 = vmatpush2.bf16.msra.mxu0 %v1705_v52 }
  0x9f   :  { %1054 = vmatpush2.bf16.msra.mxu1 %v1708_v53  ;;  %1014 = vmatprep.subr.bf16.mxu0 %v1713_v54  ;;  %v1743_v54 = vld [vmem:[#allocation9 + $0x70] sm:$0xff]  }
  0xa0   :  { %1055 = vmatprep.subr.bf16.mxu1 %v1716_v55  ;;  %v1744_v55 = vld [vmem:[#allocation9 + $0x30] sm:$0xff]  }
  0xa2   :  { %1015 = vmatpush2.bf16.msra.mxu0 %v1711_v56  ;;  %v1745_v56 = vld [vmem:[#allocation9 + $0x68] sm:$0xff]  }
  0xa3   :  { %1056 = vmatpush2.bf16.msra.mxu1 %v1714_v57  ;;  %1016 = vmatprep.subr.bf16.mxu0 %v1719_v58  ;;  %v1746_v57 = vld [vmem:[#allocation9 + $0x28] sm:$0xff]   ;;  %v1747_v58 = vld [vmem:[#allocation9 + $0x60] sm:$0xff]  }
  0xa4   :  { %1057 = vmatprep.subr.bf16.mxu1 %v1722_v59  ;;  %v1748_v59 = vld [vmem:[#allocation9 + $0x20] sm:$0xff]  }
  0xa6   :  { %1017 = vmatpush2.bf16.msra.mxu0 %v1717_v60  ;;  %v1749_v60 = vld [vmem:[#allocation9 + $0x58] sm:$0xff]  }
  0xa7   :  { %1058 = vmatpush2.bf16.msra.mxu1 %v1720_v61  ;;  %1018 = vmatprep.subr.bf16.mxu0 %v1725_v62  ;;  %v1750_v61 = vld [vmem:[#allocation9 + $0x18] sm:$0xff]   ;;  %v1751_v62 = vld [vmem:[#allocation9 + $0x50] sm:$0xff]  }
  0xa8   :  { %1059 = vmatprep.subr.bf16.mxu1 %v1728_v63  ;;  %v1752_v63 = vld [vmem:[#allocation9 + $0x10] sm:$0xff]  }
  0xaa   :  { %1019 = vmatpush2.bf16.msra.mxu0 %v1723_v0  ;;  %v1753_v0 = vld [vmem:[#allocation9 + $0x48] sm:$0xff]  }
  0xab   :  { %1060 = vmatpush2.bf16.msra.mxu1 %v1726_v2  ;;  %1020 = vmatprep.subr.bf16.mxu0 %v1731_v3  ;;  %v1754_v2 = vld [vmem:[#allocation9 + $0x8] sm:$0xff]   ;;  %v1755_v3 = vld [vmem:[#allocation9 + $0x40] sm:$0xff]  }
  0xac   :  { %1061 = vmatprep.subr.bf16.mxu1 %v1734_v4  ;;  %v1756_v4 = vld [vmem:[#allocation9] sm:$0xff]  }
  0xae   :  { %1021 = vmatpush2.bf16.msra.mxu0 %v1729_v5  ;;  %v1494_v5 = vld.sshfl [vmem:[%s1989_s4] sm:$0x11 pattern:$0x75316420] }
  0xaf   :  { %1062 = vmatpush2.bf16.msra.mxu1 %v1732_v6  ;;  %1022 = vmatprep.subr.bf16.mxu0 %v1737_v7  ;;  %v1085_v6 = vcombine.high %v1494_v5, %v1494_v5  ;;  %v1092_v7 = vrot.slane %v1494_v5, %v1950_v18 }
  0xb0   :  { %1063 = vmatprep.subr.bf16.mxu1 %v1740_v8 }
  0xb1   :  { %v1099_v8 = vrot.slane %v1085_v6, %v1950_v18 }
  0xb2   :  { %1023 = vmatpush2.bf16.msra.mxu0 %v1735_v9  ;;  %v1101_v9 = vpack.i.b16 %v1092_v7, %v1092_v7 }
  0xb3   :  { %1064 = vmatpush2.bf16.msra.mxu1 %v1738_v10  ;;  %1511 = vmatprep.subr.bf16.mxu0 %v1741_v11  ;;  %v1108_v10 = vpack.i.b16 %v1099_v8, %v1099_v8 }
  0xb4   :  { %v1106_v14 = vrot.slane %v1101_v9, %v1954_v25 }
  0xb5   :  { %v1113_v20 = vrot.slane %v1108_v10, %v1954_v25 }
 0x135   :  { %v494_v29 = vpop.f32.mrf.mxu0 }
 0x136   :  { %v535_v31 = vpop.f32.mrf.mxu1  ;;  %v542_v33 = vpack.c.bf16 %v494_v29, %v494_v29 }
 0x137   :  { %v544_v34 = vpack.c.bf16 %v535_v31, %v535_v31  ;;  %v496_v37 = vpop.f32.mrf.mxu0  ;;  %v1298_v31 = vld [vmem:[#allocation2] sm:$0x1] }
 0x138   :  { %v537_v38 = vpop.f32.mrf.mxu1  ;;  %v543_v39 = vpack.c.bf16 %v496_v37, %v496_v37  ;;  %v600_v41 = vadd.bf16 %v578_v30, %v542_v33  ;;  %v1877_v30 = vmov 0.0   ;;  %1301 = vperm.xlu0 %1556, %v1298_v31  }
 0x139   :  { %v545_v40 = vpack.c.bf16 %v537_v38, %v537_v38  ;;  %v602_v42 = vadd.bf16 %v592_v32, %v544_v34  ;;  %v498_v43 = vpop.f32.mrf.mxu0  ;;  %1535 = vmatprep.subr.bf16.mxu1 %v1877_v30  ;;  %v1287_v32 = vld [vmem:[%s1991_s6] sm:$0x1]  ;;  %s1879_s6 = smov [#allocation11]  }
 0x13a   :  { %v539_v44 = vpop.f32.mrf.mxu1  ;;  %v601_v45 = vadd.bf16 %v585_v35, %v543_v39  ;;  %v604_v52 = vmax.bf16 %v1875_v1, %v600_v41  ;;  %v1289_v33 = vpack.i.b16 %v1287_v32, %v1287_v32  ;;  %v1297_v43 = vld [vmem:[%s1992_s7] sm:$0x1]  ;;  %s1356_s17 = sshll.u32 %s1879_s6, 4  ;;  %s1357_s17 = int_to_ptr.vmem [resolvable:$true] %s1356_s17 }
 0x13b   :  { %v603_v46 = vadd.bf16 %v599_v36, %v545_v40  ;;  %v499_v47 = vpop.f32.mrf.mxu0  ;;  %v606_v53 = vmax.bf16 %v1875_v1, %v602_v42  ;;  %s1837_s8 = scalar_lea.vmem %s1357_s17, 16  ;;  %s1841_s18 = scalar_lea.vmem %s1357_s17, 32 }
 0x13c   :  { %v540_v48 = vpop.f32.mrf.mxu1  ;;  %v605_v49 = vmax.bf16 %v1875_v1, %v601_v45  ;;  %v1294_v37 = vrot.slane %v1289_v33, %v1954_v25  ;;  %p1838_p6 = scmp.ne.s32.totalorder %s1357_s17, %s1837_s8  ;;  %p1842_p7 = scmp.lt.s32.totalorder %s1357_s17, %s1357_s17 }
 0x13d   :  { %v607_v50 = vmax.bf16 %v1875_v1, %v603_v46  ;;  %p1843_p8 = scmp.lt.s32.totalorder %s1841_s18, %s1837_s8 }
 0x13e   :  { %1024 = vmatprep.mubr.bf16.mxu0 %v605_v49 }
 0x13f   :  { %1065 = vmatprep.mubr.bf16.mxu1 %v607_v50  ;;  %1025 = vmatmul.mubr.bf16.vlgmr.msra.gmra.mxu0 %v604_v52  ;;  %p1844_p9 = por %p1843_p8, %p1842_p7 }
 0x140   :  { %1066 = vmatmul.mubr.bf16.vlgmr.msra.gmra.mxu1 %v606_v53  ;;  %1512 = vmatpush3.bf16.msra.mxu0 %v1742_v51 }
 0x141   :  { %1513 = vmatprep.subr.bf16.mxu0 %v1743_v54  ;;  %1537 = vmatprep.mubr.msk.bf16.mxu1 %vm1878_vm2, %v1877_v30  ;;  %p1845_p10 = pnand %p1844_p9, %p1838_p6 }
 0x144   :  { %1514 = vmatpush3.bf16.msra.mxu0 %v1744_v55 }
 0x145   :  { %1515 = vmatprep.subr.bf16.mxu0 %v1745_v56 }
 0x148   :  { %1516 = vmatpush3.bf16.msra.mxu0 %v1746_v57 }
 0x149   :  { %1517 = vmatprep.subr.bf16.mxu0 %v1747_v58 }
 0x14c   :  { %1518 = vmatpush3.bf16.msra.mxu0 %v1748_v59 }
 0x14d   :  { %1519 = vmatprep.subr.bf16.mxu0 %v1749_v60 }
 0x150   :  { %1520 = vmatpush3.bf16.msra.mxu0 %v1750_v61 }
 0x151   :  { %1521 = vmatprep.subr.bf16.mxu0 %v1751_v62 }
 0x154   :  { %1522 = vmatpush3.bf16.msra.mxu0 %v1752_v63 }
 0x155   :  { %1523 = vmatprep.subr.bf16.mxu0 %v1753_v0 }
 0x158   :  { %1524 = vmatpush3.bf16.msra.mxu0 %v1754_v2 }
 0x159   :  { %1525 = vmatprep.subr.bf16.mxu0 %v1755_v3 }
 0x15c   :  { %1526 = vmatpush3.bf16.msra.mxu0 %v1756_v4 }
 0x1b3   :  { %v1302_v44 = vpop.permute.xlu0 %1301 }
 0x1b4   :  { %v1307_v45 = vrot.slane %v1302_v44, %v1954_v25 }
 0x1ff   :  { %v1026_v11 = vpop.f32.mrf.mxu0 }
 0x200   :  { %v1067_v12 = vpop.f32.mrf.mxu1 }
 0x201   :  { %v1068_v13 = vadd.f32 %v1067_v12, %v1026_v11  ;;  %v1028_v15 = vpop.f32.mrf.mxu0 }
 0x202   :  { %v1069_v16 = vpop.f32.mrf.mxu1 }
 0x203   :  { %v1074_v17 = vpack.c.bf16 %v1068_v13, %v1068_v13  ;;  %v1070_v19 = vadd.f32 %v1069_v16, %v1028_v15  ;;  %v1030_v21 = vpop.f32.mrf.mxu0 }
 0x204   :  { %v1071_v22 = vpop.f32.mrf.mxu1 }
 0x205   :  { %v1075_v23 = vpack.c.bf16 %v1070_v19, %v1070_v19  ;;  %v1114_v24 = vadd.bf16 %v1106_v14, %v1074_v17  ;;  %v1031_v26 = vpop.f32.mrf.mxu0 }
 0x206   :  { %v1072_v27 = vpop.f32.mrf.mxu1 }
 0x207   :  { %v1115_v18 = vadd.bf16 %v1113_v20, %v1075_v23  ;;  %v1116_v29 = vmax.bf16 %v1875_v1, %v1114_v24 }
 0x209   :  { %v1117_v28 = vmax.bf16 %v1875_v1, %v1115_v18 }
 0x20b   :  { %1278 = vmatprep.mubr.bf16.mxu0 %v1117_v28 }
 0x20c   :  { %1279 = vmatmul.mubr.bf16.vlgmr.msra.gmra.mxu0 %v1116_v29 }
 0x2cc   :  { %v1527_v34 = vpop.f32.mrf.mxu0 }
 0x2ce   :  { %v1528_v35 = vpop.f32.mrf.mxu0 }
 0x2cf   :  { %v1529_v36 = vadd.f32 %v1528_v35, %v1527_v34 }
 0x2d0   :  { %v1530_v38 = vpop.f32.mrf.mxu0 }
 0x2d1   :  { %v1286_v39 = vpack.c.bf16 %v1529_v36, %v1529_v36 }
 0x2d2   :  { %v1531_v40 = vpop.f32.mrf.mxu0 }
 0x2d3   :  { %v1295_v41 = vadd.bf16 %v1294_v37, %v1286_v39 }
 0x2d5   :  { %v1296_v42 = vmax.bf16 %v1875_v1, %v1295_v41 }
 0x2d7   :  { %1536 = vmatpush3.bf16.xpose.msra.mxu1 %v1296_v42 }
 0x2de   :  { %1538 = vmatmul.mubr.bf16.vlgmr.msra.gmra.mxu1 %v1297_v43 }
 0x39e   :  { %v1342_v46 = vpop.f32.mrf.mxu1 }
 0x39f   :  { %v1343_v47 = vadd.f32 %v1342_v46, %v1307_v45 }
 0x3a0   :  { %v1539_v48 = vpop.f32.mrf.mxu1 }
 0x3a1   :  { %1349 = vst.msk [vmem:[#allocation11] sm:$0x1] %vm1348_vm3, %v1343_v47 }
 0x3a2   :  { %v1345_v49 = vpop.f32.mrf.mxu1 }
 0x3a3   :  { %1848 = shalt.err (!%p1845_p10)
}
 0x3a4   :  { %1359 = dma.vmem_to_hbm [thread:$0]  %s1357_s17, 16, %s1994_s9, [#allocation5]   ;;  %v1540_v1 = vpop.f32.mrf.mxu1 }
 0x3a5   :  { %1863 = dma.done.wait [#allocation5], 16  }
 0x3a6   :  { %1864 = vsyncadd [#allocation5], 4294967280 }
 0x3a7   :  { %1363 = vsyncpa [#allocation4], 1 }
 0x3a8   :  { %1364 = vsyncpa [#allocation7], 1 }
 0x3a9   :  { %1365 = vsyncpa [#allocation10], 1 }
 0x3aa   :  { %1366 = vsyncpa [#allocation5], 1 }

</bundles_post_ra>
